<compile_context>
chip_gen: v7x
topology: tpu7x:2x2x1
jax: 0.10.0
libtpu: 0.0.40
codegen_flags: <defaults>
</compile_context>

<pallas_src>
import functools
import math

import jax
import jax.numpy as jnp
from jax.experimental import pallas as pl
from jax.experimental.pallas import tpu as pltpu

_LANE = 128
_SUB_BF16 = 16          # bf16 sublane packing -> keep row tiles a multiple of 16
_TM_MAX = 512           # rows per grid step (raise to 1024 on v5e/v6e if desired)
_TN_MAX = 512           # output-channel tile when OC is large and 128-aligned
_TK_MAX = 2048          # contraction handled in one shot up to this size
_VMEM_CAP = 48 * 1024 * 1024   # headroom under v7x's 64 MiB physical VMEM


def _round_up(v, m):
    return (v + m - 1) // m * m


def _dense_kernel(x_ref, w_ref, b_ref, o_ref, acc_ref, *, apply_relu):
    k = pl.program_id(2)

    @pl.when(k == 0)
    def _init():
        acc_ref[...] = jnp.zeros_like(acc_ref)

    x = x_ref[...]
    if x.dtype != jnp.bfloat16:
        x = x.astype(jnp.bfloat16)          # bf16 operands -> full-rate MXU
    acc_ref[...] += jnp.dot(x, w_ref[...], preferred_element_type=jnp.float32)

    @pl.when(k == pl.num_programs(2) - 1)
    def _finalize():
        y = acc_ref[...] + b_ref[...]       # f32 bias broadcast over rows (VPU)
        if apply_relu:
            y = jnp.maximum(y, 0.0)
        o_ref[...] = y.astype(o_ref.dtype)


def prepare_dense_params(weight, bias):
    """One-time (init-time) weight transpose + bf16 cast and bias reshape.

    weight: (OC, K)  (nn.Linear layout)  ->  (K, OC) bf16
    bias:   (OC,)                         ->  (1, OC) f32
    """
    w_t = jnp.asarray(weight, jnp.float32).T.astype(jnp.bfloat16)
    b = jnp.asarray(bias, jnp.float32).reshape(1, -1)
    return w_t, b


@functools.partial(jax.jit, static_argnames=("activation",))
def dense_forward(x, w_t, b, *, activation=True):
    """x: (..., K); w_t: (K, OC) bf16 (pre-transposed); b: (1, OC) f32 -> (..., OC) f32."""
    *lead, K = x.shape
    K_w, OC = w_t.shape
    assert K_w == K, (K_w, K)
    M = int(math.prod(lead)) if lead else 1
    x2 = x.reshape(M, K)                    # contiguous leading-dim collapse: free

    # ---- tile selection (all Python ints at trace time) -------------------
    TM = _round_up(M, _SUB_BF16) if M <= _TM_MAX else _TM_MAX
    if OC % _LANE == 0 and OC > _TN_MAX:
        TN = _TN_MAX                        # 128-aligned N tiles, masked trailing tile OK
    else:
        TN = OC                             # full-extent last dim is always legal
    if K <= _TK_MAX:
        TK = K                              # full-extent contraction, no split
    else:
        # Split K only on an exact divisor: OOB reads on the contraction axis would
        # corrupt valid outputs (unlike M/N, which are masked on store).
        TK = next((t for t in (2048, 1024, 512, 256, 128) if K % t == 0), K)

    num_m = pl.cdiv(M, TM)
    num_n = pl.cdiv(OC, TN)
    num_k = pl.cdiv(K, TK)

    # ---- explicit VMEM budget (double-buffered tiles + accumulator) -------
    vmem_need = (2 * TM * TK * x2.dtype.itemsize       # x tiles
                 + 2 * TK * TN * w_t.dtype.itemsize    # weight tiles
                 + 2 * TN * 4                          # bias tiles
                 + 2 * TM * TN * 4                     # output tiles
                 + TM * TN * 4)                        # f32 accumulator scratch
    vmem_limit = max(min(2 * vmem_need + (4 << 20), _VMEM_CAP), 16 << 20)

    out = pl.pallas_call(
        functools.partial(_dense_kernel, apply_relu=activation),
        out_shape=jax.ShapeDtypeStruct((M, OC), jnp.float32),
        grid_spec=pltpu.PrefetchScalarGridSpec(
            num_scalar_prefetch=0,
            grid=(num_m, num_n, num_k),
            in_specs=[
                pl.BlockSpec((TM, TK), lambda i, j, k: (i, k)),   # x: streamed over M/K
                pl.BlockSpec((TK, TN), lambda i, j, k: (k, j)),   # W^T tile
                pl.BlockSpec((1, TN), lambda i, j, k: (0, j)),    # bias tile
            ],
            out_specs=pl.BlockSpec((TM, TN), lambda i, j, k: (i, j)),
            scratch_shapes=[pltpu.VMEM((TM, TN), jnp.float32)],
        ),
        compiler_params=pltpu.CompilerParams(
            # M / N tiles are independent (shard across TensorCores); K is a reduction.
            dimension_semantics=("parallel", "parallel", "arbitrary"),
            vmem_limit_bytes=int(vmem_limit),
        ),
    )(x2, w_t, b)

    # TODO(synk): Dropout for drop_rate > 0.0 (train-time masking) would use
    # pltpu.prng_seed + pltpu.stateful_bernoulli in-kernel; the module default
    # (drop_rate=0.0) has no dropout, so it is omitted here.
    return out.reshape(*lead, OC) if lead else out.reshape(OC)


def _reference(x, weight, bias, activation=True, bf16_operands=False):
    xr, wr = x, weight
    if bf16_operands:
        xr = x.astype(jnp.bfloat16).astype(jnp.float32)
        wr = weight.astype(jnp.bfloat16).astype(jnp.float32)
    y = jnp.einsum("...k,ok->...o", xr, wr) + bias
    if activation:
        y = jnp.maximum(y, 0.0)
    return y


if __name__ == "__main__":
    # Shapes consistent with Dense(in_features=32, out_features=64) applied to a
    # (batch=2, points=8, in_features=32) feature tensor.
    B, P, IN_F, OUT_F = 2, 8, 32, 64

    key = jax.random.PRNGKey(0)
    kx, kw, kb = jax.random.split(key, 3)
    x = jax.random.normal(kx, (B, P, IN_F), dtype=jnp.float32)
    # nn.Linear layout: weight (OUT_F, IN_F), bias (OUT_F,)
    weight = jax.random.normal(kw, (OUT_F, IN_F), dtype=jnp.float32) * 0.1
    bias = 0.1 * jax.random.normal(kb, (OUT_F,), dtype=jnp.float32)

    # One-time parameter prep (hoisted out of the per-forward path).
    w_t, b2 = prepare_dense_params(weight, bias)

    out = jax.block_until_ready(dense_forward(x, w_t, b2, activation=True))
    assert out.shape == (B, P, OUT_F), out.shape

    # Tight check against a reference that uses the same bf16 MXU operands.
    ref_bf16 = jax.block_until_ready(_reference(x, weight, bias, True, bf16_operands=True))
    assert jnp.allclose(out, ref_bf16, rtol=1e-3, atol=1e-3), float(
        jnp.max(jnp.abs(out - ref_bf16)))
    # Loose check against the full-f32 reference (bf16 operand quantization only).
    ref_f32 = jax.block_until_ready(_reference(x, weight, bias, True))
    assert jnp.allclose(out, ref_f32, rtol=3e-2, atol=3e-2), float(
        jnp.max(jnp.abs(out - ref_f32)))

    print("KERNEL_OK")
</pallas_src>

<mosaic_0001>
module attributes {stable_mosaic.version = 11 : i64} {
  func.func @_dense_kernel(%arg0: i32, %arg1: i32, %arg2: i32, %arg3: memref<16x32xf32, #tpu.memory_space<vmem>>, %arg4: memref<32x64xbf16, #tpu.memory_space<vmem>>, %arg5: memref<1x64xf32, #tpu.memory_space<vmem>>, %arg6: memref<16x64xf32, #tpu.memory_space<vmem>>, %arg7: memref<16x64xf32, #tpu.memory_space<vmem>>) attributes {dimension_semantics = [#tpu.dimension_semantics<parallel>, #tpu.dimension_semantics<parallel>, #tpu.dimension_semantics<arbitrary>], iteration_bounds = array<i64: 1, 1, 1>, scalar_prefetch = 0 : i64, scratch_operands = 1 : i64, tpu.core_type = #tpu.core_type<tc>, window_params = [{transform_indices = @transform_0, window_bounds = array<i64: 16, 32>}, {transform_indices = @transform_1, window_bounds = array<i64: 32, 64>}, {transform_indices = @transform_2, window_bounds = array<i64: 1, 64>}, {transform_indices = @transform_3, window_bounds = array<i64: 16, 64>}]} {
    %c0_i32 = arith.constant 0 : i32
    %0 = arith.cmpi eq, %arg2, %c0_i32 : i32
    %1 = arith.extui %0 : i1 to i32
    %c0_i32_0 = arith.constant 0 : i32
    %2 = arith.cmpi ne, %1, %c0_i32_0 : i32
    scf.if %2 {
      %cst_10 = arith.constant 0.000000e+00 : f32
      %13 = vector.broadcast %cst_10 : f32 to vector<16x64xf32>
      %c0_11 = arith.constant 0 : index
      %c0_12 = arith.constant 0 : index
      %14 = vector.load %arg7[%c0_11, %c0_12] : memref<16x64xf32, #tpu.memory_space<vmem>>, vector<16x64xf32>
      tpu.vector_store %arg7[%c0_11, %c0_12], %13 {strides = array<i32>} : memref<16x64xf32, #tpu.memory_space<vmem>>, vector<16x64xf32>,
    } else {
    }
    %c0 = arith.constant 0 : index
    %c0_1 = arith.constant 0 : index
    %3 = vector.load %arg3[%c0, %c0_1] : memref<16x32xf32, #tpu.memory_space<vmem>>, vector<16x32xf32>
    %4 = arith.truncf %3 : vector<16x32xf32> to vector<16x32xbf16>
    %c0_2 = arith.constant 0 : index
    %c0_3 = arith.constant 0 : index
    %5 = vector.load %arg7[%c0_2, %c0_3] : memref<16x64xf32, #tpu.memory_space<vmem>>, vector<16x64xf32>
    %c0_4 = arith.constant 0 : index
    %c0_5 = arith.constant 0 : index
    %6 = vector.load %arg4[%c0_4, %c0_5] : memref<32x64xbf16, #tpu.memory_space<vmem>>, vector<32x64xbf16>
    %cst = arith.constant dense<0.000000e+00> : vector<16x64xf32>
    %7 = tpu.matmul %4, %6, %cst {dimension_numbers = #tpu.dot_dimension_numbers<[1], [0], [0], [1], [0, 0, 1, 1], [], []>} : vector<16x32xbf16>, vector<32x64xbf16>, vector<16x64xf32> -> vector<16x64xf32>
    %8 = arith.addf %5, %7 : vector<16x64xf32>
    %c0_6 = arith.constant 0 : index
    %c0_7 = arith.constant 0 : index
    %9 = vector.load %arg7[%c0_6, %c0_7] : memref<16x64xf32, #tpu.memory_space<vmem>>, vector<16x64xf32>
    tpu.vector_store %arg7[%c0_6, %c0_7], %8 {strides = array<i32>} : memref<16x64xf32, #tpu.memory_space<vmem>>, vector<16x64xf32>,
    %c0_i32_8 = arith.constant 0 : i32
    %10 = arith.cmpi eq, %arg2, %c0_i32_8 : i32
    %11 = arith.extui %10 : i1 to i32
    %c0_i32_9 = arith.constant 0 : i32
    %12 = arith.cmpi ne, %11, %c0_i32_9 : i32
    scf.if %12 {
      %c0_10 = arith.constant 0 : index
      %c0_11 = arith.constant 0 : index
      %13 = vector.load %arg7[%c0_10, %c0_11] : memref<16x64xf32, #tpu.memory_space<vmem>>, vector<16x64xf32>
      %c0_12 = arith.constant 0 : index
      %c0_13 = arith.constant 0 : index
      %14 = vector.load %arg5[%c0_12, %c0_13] : memref<1x64xf32, #tpu.memory_space<vmem>>, vector<1x64xf32>
      %15 = vector.broadcast %14 : vector<1x64xf32> to vector<16x64xf32>
      %16 = arith.addf %13, %15 : vector<16x64xf32>
      %cst_14 = arith.constant 0.000000e+00 : f32
      %17 = vector.broadcast %cst_14 : f32 to vector<16x64xf32>
      %18 = arith.maximumf %16, %17 : vector<16x64xf32>
      %c0_15 = arith.constant 0 : index
      %c0_16 = arith.constant 0 : index
      %19 = vector.load %arg6[%c0_15, %c0_16] : memref<16x64xf32, #tpu.memory_space<vmem>>, vector<16x64xf32>
      tpu.vector_store %arg6[%c0_15, %c0_16], %18 {strides = array<i32>} : memref<16x64xf32, #tpu.memory_space<vmem>>, vector<16x64xf32>,
    } else {
    }
    return
  }
  func.func @transform_0(%arg0: i32, %arg1: i32, %arg2: i32) -> (i32, i32) {
    %c0_i32 = arith.constant 0 : i32
    return %arg0, %arg2 : i32, i32
  }
  func.func @transform_1(%arg0: i32, %arg1: i32, %arg2: i32) -> (i32, i32) {
    %c0_i32 = arith.constant 0 : i32
    return %arg2, %arg1 : i32, i32
  }
  func.func @transform_2(%arg0: i32, %arg1: i32, %arg2: i32) -> (i32, i32) {
    %c0_i32 = arith.constant 0 : i32
    %c0_i32_0 = arith.constant 0 : i32
    return %c0_i32, %arg1 : i32, i32
  }
  func.func @transform_3(%arg0: i32, %arg1: i32, %arg2: i32) -> (i32, i32) {
    %c0_i32 = arith.constant 0 : i32
    return %arg0, %arg1 : i32, i32
  }
}

</mosaic_0001>

<bundles_post_ra>
// kernel: dense_forward.1
= control target key start
LH: loop header
LB: loop body
LE: loop exit
PB: predicated region body
PF: predicated region fallthrough
CT: control target
= control target key end

     0   :  { %8 = vsyncpa [#allocation4], 0  ;;  %s336_s0 = inlined_call_operand.hbm [shape: f32[16,32], index: 0, kind: input, shape index: {}]   ;;  %s337_s1 = inlined_call_operand.hbm [shape: bf16[32,64], index: 1, kind: input, shape index: {}]   ;;  %s338_s2 = inlined_call_operand.vmem [shape: f32[1,64], index: 2, kind: input, shape index: {}]   ;;  %s339_s3 = inlined_call_operand.hbm [shape: f32[16,64], index: 3, kind: output, shape index: {}]  }
   0x1   :  { %9 = vsyncpa [#allocation7], 0 }
   0x2   :  { %10 = vsyncpa [#allocation5], 0  ;;  %s256_s12 = smov [#allocation3]   ;;  %s184_s16 = scalar_lea.hbm %s336_s0, 256 }
   0x3   :  { %s16_s13 = sshll.u32 %s256_s12, 4  ;;  %p185_p0 = scmp.ne.s32.totalorder %s336_s0, %s184_s16  ;;  %s17_s13 = int_to_ptr.vmem [resolvable:$true] %s16_s13 }
   0x4   :  { %p188_p1 = scmp.lt.u32.totalorder %s184_s16, %s336_s0 }
   0x6   :  { %p190_p2 = pnand %p188_p1, %p185_p0 }
   0x8   :  { %193 = shalt.err (!%p190_p2)
}
   0x9   :  { %s194_s21 = scalar_lea.vmem %s17_s13, 256  ;;  %p199_p4 = scmp.lt.s32.totalorder %s17_s13, %s17_s13 }
   0xa   :  { %p195_p3 = scmp.ne.s32.totalorder %s17_s13, %s194_s21  ;;  %p200_p5 = scmp.lt.s32.totalorder %s194_s21, %s194_s21 }
   0xc   :  { %p201_p6 = por %p200_p5, %p199_p4 }
   0xe   :  { %p202_p7 = pnand %p201_p6, %p195_p3 }
  0x10   :  { %205 = shalt.err (!%p202_p7)
}
  0x11   :  { %s257_s22 = smov 128   ;;  %s258_s23 = smov 8  }
  0x12   :  { %22 = dma.hbm_to_vmem [thread:$0]  %s336_s0, 256, %s17_s13, [#allocation4], %s257_s22, %s257_s22, %s258_s23  }
  0x13   :  { %s259_s26 = smov [#allocation6]   ;;  %s206_s30 = scalar_lea.hbm %s337_s1, 256 }
  0x14   :  { %s28_s27 = sshll.u32 %s259_s26, 4  ;;  %p207_p8 = scmp.ne.s32.totalorder %s337_s1, %s206_s30  ;;  %s29_s27 = int_to_ptr.vmem [resolvable:$true] %s28_s27 }
  0x15   :  { %p210_p9 = scmp.lt.u32.totalorder %s206_s30, %s337_s1 }
  0x17   :  { %p212_p10 = pnand %p210_p9, %p207_p8 }
  0x19   :  { %215 = shalt.err (!%p212_p10)
}
  0x1a   :  { %s216_s8 = scalar_lea.vmem %s29_s27, 256  ;;  %p221_p12 = scmp.lt.s32.totalorder %s29_s27, %s29_s27 }
  0x1b   :  { %p217_p11 = scmp.ne.s32.totalorder %s29_s27, %s216_s8  ;;  %p222_p13 = scmp.lt.s32.totalorder %s216_s8, %s216_s8 }
  0x1d   :  { %p223_p0 = por %p222_p13, %p221_p12 }
  0x1f   :  { %p224_p1 = pnand %p223_p0, %p217_p11 }
  0x21   :  { %227 = shalt.err (!%p224_p1)
}
  0x22   :  { %s260_s0 = smov 64   ;;  %s261_s9 = smov 4  }
  0x23   :  { %34 = dma.hbm_to_vmem [thread:$0]  %s337_s1, 256, %s29_s27, [#allocation7], %s260_s0, %s260_s0, %s261_s9  }
  0x24   :  { %250 = dma.done.wait [#allocation4], 256  }
  0x25   :  { %251 = vsyncadd [#allocation4], 4294967040 }
  0x26   :  { %252 = dma.done.wait [#allocation7], 256  }
  0x27   :  { %253 = vsyncadd [#allocation7], 4294967040  ;;  %vm48_vm0 = vcmask 523264   ;;  %v262_v0 = vmov 0.0   ;;  %vm263_vm1 = vmmov 0   ;;  %v182_v1 = vld [vmem:[#allocation6] sm:$0xff]  }
  0x28   :  { %49 = vst.msk [vmem:[#allocation2] sm:$0xff] %vm48_vm0, %v262_v0  ;;  %50 = vst.msk [vmem:[#allocation2 + $0x8] sm:$0xff] %vm48_vm0, %v262_v0  ;;  %165 = vmatprep.subr.bf16.mxu0 %v262_v0  ;;  %169 = vmatprep.mubr.msk.bf16.mxu0 %vm263_vm1, %v262_v0  ;;  %v183_v2 = vld [vmem:[#allocation6 + $0x8] sm:$0xff]   ;;  %v51_v3 = vld [vmem:[#allocation3] sm:$0xff]  ;;  %vm72_vm2 = vcmask 261120   ;;  %s264_s13 = smov [#allocation8]  }
  0x29   :  { %166 = vmatpush3.bf16.msra.mxu0 %v182_v1  ;;  %v52_v4 = vld [vmem:[#allocation3 + $0x8] sm:$0xff]  ;;  %v161_v14 = vld [vmem:[%s338_s2] ss:$0 sm:$0xff]  ;;  %s145_s14 = sshll.u32 %s264_s13, 4  ;;  %s146_s14 = int_to_ptr.vmem [resolvable:$true] %s145_s14 }
  0x2a   :  { %167 = vmatprep.subr.bf16.mxu0 %v262_v0  ;;  %v53_v5 = vpack.c.bf16 %v52_v4, %v51_v3  ;;  %s228_s15 = scalar_lea.vmem %s146_s14, 256  ;;  %p233_p3 = scmp.lt.s32.totalorder %s146_s14, %s146_s14 }
  0x2b   :  { %p229_p2 = scmp.ne.s32.totalorder %s146_s14, %s228_s15  ;;  %p234_p4 = scmp.lt.s32.totalorder %s228_s15, %s228_s15 }
  0x2d   :  { %168 = vmatpush3.bf16.msra.mxu0 %v183_v2  ;;  %p235_p5 = por %p234_p4, %p233_p3 }
  0x2f   :  { %v54_v6 = vld [vmem:[#allocation2] sm:$0xff]  ;;  %v55_v8 = vld [vmem:[#allocation2 + $0x8] sm:$0xff]  ;;  %p236_p6 = pnand %p235_p5, %p229_p2 }
  0x30   :  { %170 = vmatmul.mubr.msk.bf16.vlgmr.msra.gmra.mrb[0].mxu0 %vm72_vm2, %v53_v5 }
 0x103   :  { %v110_v7 = vpop.f32.mrb[0].mxu0 }
 0x104   :  { %v117_v9 = vadd.f32 %v110_v7, %v54_v6  ;;  %v171_v10 = vpop.f32.mrb[1].mxu0 }
 0x105   :  { %v113_v11 = vpop.f32.mrb[2].mxu0 }
 0x106   :  { %120 = vst.msk [vmem:[#allocation2] sm:$0xff] %vm48_vm0, %v117_v9  ;;  %v118_v12 = vadd.f32 %v113_v11, %v55_v8  ;;  %v172_v13 = vpop.f32.mrb[3].mxu0 }
 0x108   :  { %121 = vst.msk [vmem:[#allocation2 + $0x8] sm:$0xff] %vm48_vm0, %v118_v12 }
 0x10d   :  { %v125_v15 = vld [vmem:[#allocation2] sm:$0xff] }
 0x10e   :  { %v134_v16 = vadd.f32 %v161_v14, %v125_v15 }
 0x10f   :  { %v126_v17 = vld [vmem:[#allocation2 + $0x8] sm:$0xff] }
 0x110   :  { %v135_v18 = vadd.f32 %v161_v14, %v126_v17  ;;  %v136_v19 = vmax.f32 %v134_v16, 0.0 }
 0x112   :  { %v137_v20 = vmax.f32 %v135_v18, 0.0  ;;  %138 = vst.msk [vmem:[#allocation8] sm:$0xff] %vm48_vm0, %v136_v19 }
 0x114   :  { %139 = vst.msk [vmem:[#allocation8 + $0x8] sm:$0xff] %vm48_vm0, %v137_v20 }
 0x115   :  { %239 = shalt.err (!%p236_p6)
}
 0x116   :  { %s240_s17 = scalar_lea.hbm %s339_s3, 256 }
 0x117   :  { %p241_p7 = scmp.ne.s32.totalorder %s339_s3, %s240_s17  ;;  %p244_p8 = scmp.lt.u32.totalorder %s240_s17, %s339_s3 }
 0x119   :  { %p246_p9 = pnand %p244_p8, %p241_p7 }
 0x11b   :  { %249 = shalt.err (!%p246_p9)
}
 0x11c   :  { %151 = dma.vmem_to_hbm [thread:$0]  %s146_s14, 256, %s339_s3, [#allocation5], %s257_s22, %s257_s22, %s258_s23  }
 0x11d   :  { %254 = dma.done.wait [#allocation5], 256  }
 0x11e   :  { %255 = vsyncadd [#allocation5], 4294967040 }
 0x11f   :  { %155 = vsyncpa [#allocation4], 1 }
 0x120   :  { %156 = vsyncpa [#allocation7], 1 }
 0x121   :  { %157 = vsyncpa [#allocation5], 1 }

</bundles_post_ra>
